<compile_context>
chip_gen: v7x
topology: tpu7x:2x2x1
jax: 0.10.0
libtpu: 0.0.40
codegen_flags: <defaults>
</compile_context>

<pallas_src>
import jax
import jax.numpy as jnp
from jax.experimental import pallas as pl
from jax.experimental.pallas import tpu as pltpu

HIDDEN1 = 400
HIDDEN2 = 300

# Lane-aligned (padded) widths used inside the kernel; padding is zero-filled
# so the forward math is identical to the unpadded network.
H1_PAD = 512      # 400 -> 512
H2_PAD = 384      # 300 -> 384
OUT_LANES = 128   # n_out padded up to one full lane width


def _round_up(x, m):
    return (x + m - 1) // m * m


def qnet_kernel(x_ref, w1_ref, b1_ref, w2_ref, b2_ref, w3_ref, b3_ref, o_ref):
    # layer1 + ReLU  (bf16 operands, f32 accumulation on the MXU)
    h1 = jnp.dot(x_ref[...], w1_ref[...], preferred_element_type=jnp.float32)
    h1 = jnp.maximum(h1 + b1_ref[...], 0.0).astype(jnp.bfloat16)
    # layer2 + ReLU
    h2 = jnp.dot(h1, w2_ref[...], preferred_element_type=jnp.float32)
    h2 = jnp.maximum(h2 + b2_ref[...], 0.0).astype(jnp.bfloat16)
    # layer3 (no activation)
    out = jnp.dot(h2, w3_ref[...], preferred_element_type=jnp.float32)
    o_ref[...] = (out + b3_ref[...]).astype(o_ref.dtype)


def qnet_forward(x, params, n_out, *, block_rows=512):
    """x: (B, n_in) float array. params: padded, pre-transposed params from init_params.
    Returns (B, n_out) float32."""
    w1, b1, w2, b2, w3, b3 = params
    B, n_in = x.shape

    # Batch tiling: biggest tile up to `block_rows`, sublane-aligned (multiple of 8).
    tm = min(block_rows, _round_up(B, 8))
    b_pad = _round_up(B, tm)
    if b_pad != B:
        x = jnp.pad(x, ((0, b_pad - B), (0, 0)))
    x = x.astype(jnp.bfloat16)
    n_blocks = b_pad // tm

    grid_spec = pltpu.PrefetchScalarGridSpec(
        num_scalar_prefetch=0,
        grid=(n_blocks,),
        in_specs=[
            # x: one batch tile per grid step.
            pl.BlockSpec((tm, n_in), lambda i: (i, 0)),
            # Weights / biases: constant index_map -> resident in VMEM, DMA'd once.
            pl.BlockSpec(w1.shape, lambda i: (0, 0)),
            pl.BlockSpec(b1.shape, lambda i: (0, 0)),
            pl.BlockSpec(w2.shape, lambda i: (0, 0)),
            pl.BlockSpec(b2.shape, lambda i: (0, 0)),
            pl.BlockSpec(w3.shape, lambda i: (0, 0)),
            pl.BlockSpec(b3.shape, lambda i: (0, 0)),
        ],
        out_specs=pl.BlockSpec((tm, OUT_LANES), lambda i: (i, 0)),
    )

    out_padded = pl.pallas_call(
        qnet_kernel,
        out_shape=jax.ShapeDtypeStruct((b_pad, OUT_LANES), jnp.float32),
        grid_spec=grid_spec,
        compiler_params=pltpu.CompilerParams(
            dimension_semantics=("parallel",),
        ),
    )(x, w1, b1, w2, b2, w3, b3)

    # Slice away batch and lane padding.
    return out_padded[:B, :n_out]


def init_params(key, n_in, n_out):
    """Deterministic init mimicking PyTorch nn.Linear default (uniform +/- 1/sqrt(fan_in)).
    Weights are stored pre-transposed as (in_features, out_features), zero-padded to
    lane-aligned widths, and cast to bf16. Biases stay f32, zero-padded, shape (1, N_pad)."""
    ks = jax.random.split(key, 6)

    def lin(kw, kb, fan_in, fan_out, fan_in_pad, fan_out_pad):
        bound = 1.0 / jnp.sqrt(jnp.float32(fan_in))
        w = jax.random.uniform(kw, (fan_in, fan_out), jnp.float32, -bound, bound)
        b = jax.random.uniform(kb, (1, fan_out), jnp.float32, -bound, bound)
        w = jnp.pad(w, ((0, fan_in_pad - fan_in), (0, fan_out_pad - fan_out)))
        b = jnp.pad(b, ((0, 0), (0, fan_out_pad - fan_out)))
        return w.astype(jnp.bfloat16), b

    w1, b1 = lin(ks[0], ks[1], n_in, HIDDEN1, n_in, H1_PAD)
    w2, b2 = lin(ks[2], ks[3], HIDDEN1, HIDDEN2, H1_PAD, H2_PAD)
    w3, b3 = lin(ks[4], ks[5], HIDDEN2, n_out, H2_PAD, OUT_LANES)
    return (w1, b1, w2, b2, w3, b3)


if __name__ == "__main__":
    key = jax.random.PRNGKey(0)
    k_x, k_p = jax.random.split(key)

    B, n_in, n_out = 8, 16, 4          # small shapes consistent with a Q-network
    x = jax.random.normal(k_x, (B, n_in), jnp.float32)
    params = init_params(k_p, n_in, n_out)

    out = qnet_forward(x, params, n_out)
    jax.block_until_ready(out)

    # Cross-check against a pure-JAX reference using the same bf16-rounded weights
    # (kernel keeps intermediates in bf16 between layers, hence the looser tolerance).
    w1, b1, w2, b2, w3, b3 = params
    xf = x.astype(jnp.bfloat16).astype(jnp.float32)
    ref = jnp.maximum(xf @ w1.astype(jnp.float32) + b1, 0.0)
    ref = jnp.maximum(ref @ w2.astype(jnp.float32) + b2, 0.0)
    ref = (ref @ w3.astype(jnp.float32) + b3)[:, :n_out]

    assert out.shape == (B, n_out)
    assert jnp.allclose(out, ref, atol=2e-2, rtol=2e-2)

    print("KERNEL_OK")
</pallas_src>

<mosaic_0001>
module attributes {stable_mosaic.version = 11 : i64} {
  func.func @qnet_kernel(%arg0: i32, %arg1: memref<8x16xbf16, #tpu.memory_space<vmem>>, %arg2: memref<16x512xbf16, #tpu.memory_space<vmem>>, %arg3: memref<1x512xf32, #tpu.memory_space<vmem>>, %arg4: memref<512x384xbf16, #tpu.memory_space<vmem>>, %arg5: memref<1x384xf32, #tpu.memory_space<vmem>>, %arg6: memref<384x128xbf16, #tpu.memory_space<vmem>>, %arg7: memref<1x128xf32, #tpu.memory_space<vmem>>, %arg8: memref<8x128xf32, #tpu.memory_space<vmem>>) attributes {dimension_semantics = [#tpu.dimension_semantics<parallel>], iteration_bounds = array<i64: 1>, scalar_prefetch = 0 : i64, scratch_operands = 0 : i64, tpu.core_type = #tpu.core_type<tc>, window_params = [{transform_indices = @transform_0, window_bounds = array<i64: 8, 16>}, {pipeline_mode = #tpu.pipeline_mode<synchronous>, transform_indices = @transform_1, window_bounds = array<i64: 16, 512>}, {pipeline_mode = #tpu.pipeline_mode<synchronous>, transform_indices = @transform_2, window_bounds = array<i64: 1, 512>}, {pipeline_mode = #tpu.pipeline_mode<synchronous>, transform_indices = @transform_3, window_bounds = array<i64: 512, 384>}, {pipeline_mode = #tpu.pipeline_mode<synchronous>, transform_indices = @transform_4, window_bounds = array<i64: 1, 384>}, {pipeline_mode = #tpu.pipeline_mode<synchronous>, transform_indices = @transform_5, window_bounds = array<i64: 384, 128>}, {pipeline_mode = #tpu.pipeline_mode<synchronous>, transform_indices = @transform_6, window_bounds = array<i64: 1, 128>}, {transform_indices = @transform_7, window_bounds = array<i64: 8, 128>}]} {
    %c0 = arith.constant 0 : index
    %c0_0 = arith.constant 0 : index
    %0 = vector.load %arg1[%c0, %c0_0] : memref<8x16xbf16, #tpu.memory_space<vmem>>, vector<8x16xbf16>
    %c0_1 = arith.constant 0 : index
    %c0_2 = arith.constant 0 : index
    %1 = vector.load %arg2[%c0_1, %c0_2] : memref<16x512xbf16, #tpu.memory_space<vmem>>, vector<16x512xbf16>
    %cst = arith.constant dense<0.000000e+00> : vector<8x512xf32>
    %2 = tpu.matmul %0, %1, %cst {dimension_numbers = #tpu.dot_dimension_numbers<[1], [0], [0], [1], [0, 0, 1, 1], [], []>} : vector<8x16xbf16>, vector<16x512xbf16>, vector<8x512xf32> -> vector<8x512xf32>
    %c0_3 = arith.constant 0 : index
    %c0_4 = arith.constant 0 : index
    %3 = vector.load %arg3[%c0_3, %c0_4] : memref<1x512xf32, #tpu.memory_space<vmem>>, vector<1x512xf32>
    %4 = vector.broadcast %3 : vector<1x512xf32> to vector<8x512xf32>
    %5 = arith.addf %2, %4 : vector<8x512xf32>
    %cst_5 = arith.constant 0.000000e+00 : f32
    %6 = vector.broadcast %cst_5 : f32 to vector<8x512xf32>
    %7 = arith.maximumf %5, %6 : vector<8x512xf32>
    %8 = arith.truncf %7 : vector<8x512xf32> to vector<8x512xbf16>
    %c0_6 = arith.constant 0 : index
    %c0_7 = arith.constant 0 : index
    %9 = vector.load %arg4[%c0_6, %c0_7] : memref<512x384xbf16, #tpu.memory_space<vmem>>, vector<512x384xbf16>
    %cst_8 = arith.constant dense<0.000000e+00> : vector<8x384xf32>
    %10 = tpu.matmul %8, %9, %cst_8 {dimension_numbers = #tpu.dot_dimension_numbers<[1], [0], [0], [1], [0, 0, 1, 1], [], []>} : vector<8x512xbf16>, vector<512x384xbf16>, vector<8x384xf32> -> vector<8x384xf32>
    %c0_9 = arith.constant 0 : index
    %c0_10 = arith.constant 0 : index
    %11 = vector.load %arg5[%c0_9, %c0_10] : memref<1x384xf32, #tpu.memory_space<vmem>>, vector<1x384xf32>
    %12 = vector.broadcast %11 : vector<1x384xf32> to vector<8x384xf32>
    %13 = arith.addf %10, %12 : vector<8x384xf32>
    %cst_11 = arith.constant 0.000000e+00 : f32
    %14 = vector.broadcast %cst_11 : f32 to vector<8x384xf32>
    %15 = arith.maximumf %13, %14 : vector<8x384xf32>
    %16 = arith.truncf %15 : vector<8x384xf32> to vector<8x384xbf16>
    %c0_12 = arith.constant 0 : index
    %c0_13 = arith.constant 0 : index
    %17 = vector.load %arg6[%c0_12, %c0_13] : memref<384x128xbf16, #tpu.memory_space<vmem>>, vector<384x128xbf16>
    %cst_14 = arith.constant dense<0.000000e+00> : vector<8x128xf32>
    %18 = tpu.matmul %16, %17, %cst_14 {dimension_numbers = #tpu.dot_dimension_numbers<[1], [0], [0], [1], [0, 0, 1, 1], [], []>} : vector<8x384xbf16>, vector<384x128xbf16>, vector<8x128xf32> -> vector<8x128xf32>
    %c0_15 = arith.constant 0 : index
    %c0_16 = arith.constant 0 : index
    %19 = vector.load %arg7[%c0_15, %c0_16] : memref<1x128xf32, #tpu.memory_space<vmem>>, vector<1x128xf32>
    %20 = vector.broadcast %19 : vector<1x128xf32> to vector<8x128xf32>
    %21 = arith.addf %18, %20 : vector<8x128xf32>
    %c0_17 = arith.constant 0 : index
    %c0_18 = arith.constant 0 : index
    %22 = vector.load %arg8[%c0_17, %c0_18] : memref<8x128xf32, #tpu.memory_space<vmem>>, vector<8x128xf32>
    tpu.vector_store %arg8[%c0_17, %c0_18], %21 {strides = array<i32>} : memref<8x128xf32, #tpu.memory_space<vmem>>, vector<8x128xf32>,
    return
  }
  func.func @transform_0(%arg0: i32) -> (i32, i32) {
    %c0_i32 = arith.constant 0 : i32
    %c0_i32_0 = arith.constant 0 : i32
    return %arg0, %c0_i32 : i32, i32
  }
  func.func @transform_1(%arg0: i32) -> (i32, i32) {
    %c0_i32 = arith.constant 0 : i32
    %c0_i32_0 = arith.constant 0 : i32
    %c0_i32_1 = arith.constant 0 : i32
    return %c0_i32, %c0_i32_0 : i32, i32
  }
  func.func @transform_2(%arg0: i32) -> (i32, i32) {
    %c0_i32 = arith.constant 0 : i32
    %c0_i32_0 = arith.constant 0 : i32
    %c0_i32_1 = arith.constant 0 : i32
    return %c0_i32, %c0_i32_0 : i32, i32
  }
  func.func @transform_3(%arg0: i32) -> (i32, i32) {
    %c0_i32 = arith.constant 0 : i32
    %c0_i32_0 = arith.constant 0 : i32
    %c0_i32_1 = arith.constant 0 : i32
    return %c0_i32, %c0_i32_0 : i32, i32
  }
  func.func @transform_4(%arg0: i32) -> (i32, i32) {
    %c0_i32 = arith.constant 0 : i32
    %c0_i32_0 = arith.constant 0 : i32
    %c0_i32_1 = arith.constant 0 : i32
    return %c0_i32, %c0_i32_0 : i32, i32
  }
  func.func @transform_5(%arg0: i32) -> (i32, i32) {
    %c0_i32 = arith.constant 0 : i32
    %c0_i32_0 = arith.constant 0 : i32
    %c0_i32_1 = arith.constant 0 : i32
    return %c0_i32, %c0_i32_0 : i32, i32
  }
  func.func @transform_6(%arg0: i32) -> (i32, i32) {
    %c0_i32 = arith.constant 0 : i32
    %c0_i32_0 = arith.constant 0 : i32
    %c0_i32_1 = arith.constant 0 : i32
    return %c0_i32, %c0_i32_0 : i32, i32
  }
  func.func @transform_7(%arg0: i32) -> (i32, i32) {
    %c0_i32 = arith.constant 0 : i32
    %c0_i32_0 = arith.constant 0 : i32
    return %arg0, %c0_i32 : i32, i32
  }
}

</mosaic_0001>

<bundles_post_ra>
// kernel: tpu_custom_call.1
= control target key start
LH: loop header
LB: loop body
LE: loop exit
PB: predicated region body
PF: predicated region fallthrough
CT: control target
= control target key end

     0   :  { %12 = vsyncpa [#allocation3], 0  ;;  %s2012_s0 = inlined_call_operand.hbm [shape: bf16[8,16], index: 0, kind: input, shape index: {}]   ;;  %s2013_s1 = inlined_call_operand.hbm [shape: bf16[16,512], index: 1, kind: input, shape index: {}]   ;;  %s2014_s2 = inlined_call_operand.vmem [shape: f32[1,512], index: 2, kind: input, shape index: {}]   ;;  %s2015_s3 = inlined_call_operand.hbm [shape: bf16[512,384], index: 3, kind: input, shape index: {}]   ;;  %s2016_s4 = inlined_call_operand.vmem [shape: f32[1,384], index: 4, kind: input, shape index: {}]   ;;  %s2017_s5 = inlined_call_operand.hbm [shape: bf16[384,128], index: 5, kind: input, shape index: {}]   ;;  %s2018_s6 = inlined_call_operand.vmem [shape: f32[1,128], index: 6, kind: input, shape index: {}]   ;;  %s2019_s7 = inlined_call_operand.hbm [shape: f32[8,128], index: 7, kind: output, shape index: {}]  }
   0x1   :  { %13 = vsyncpa [#allocation6], 0 }
   0x2   :  { %14 = vsyncpa [#allocation9], 0 }
   0x3   :  { %15 = vsyncpa [#allocation4], 0  ;;  %s1862_s24 = smov [#allocation5]   ;;  %s1744_s28 = scalar_lea.hbm %s2013_s1, 512 }
   0x4   :  { %s31_s25 = sshll.u32 %s1862_s24, 4  ;;  %p1745_p0 = scmp.ne.s32.totalorder %s2013_s1, %s1744_s28  ;;  %s32_s25 = int_to_ptr.vmem [resolvable:$true] %s31_s25 }
   0x5   :  { %p1748_p1 = scmp.lt.u32.totalorder %s1744_s28, %s2013_s1 }
   0x7   :  { %p1750_p2 = pnand %p1748_p1, %p1745_p0 }
   0x9   :  { %1753 = shalt.err (!%p1750_p2)
}
   0xa   :  { %s1754_s10 = scalar_lea.vmem %s32_s25, 512  ;;  %p1759_p4 = scmp.lt.s32.totalorder %s32_s25, %s32_s25 }
   0xb   :  { %p1755_p3 = scmp.ne.s32.totalorder %s32_s25, %s1754_s10  ;;  %p1760_p5 = scmp.lt.s32.totalorder %s1754_s10, %s1754_s10 }
   0xd   :  { %p1761_p6 = por %p1760_p5, %p1759_p4 }
   0xf   :  { %p1762_p7 = pnand %p1761_p6, %p1755_p3 }
  0x11   :  { %1765 = shalt.err (!%p1762_p7)
}
  0x12   :  { %s1863_s11 = smov 256   ;;  %s1864_s12 = smov 16  }
  0x13   :  { %37 = dma.hbm_to_vmem [thread:$0]  %s2013_s1, 512, %s32_s25, [#allocation6], %s1863_s11, %s1863_s11, %s1864_s12  }
  0x14   :  { %s1865_s15 = smov [#allocation2]   ;;  %s1866_s17 = smov [#allocation7]  }
  0x15   :  { %s22_s16 = sshll.u32 %s1865_s15, 4  ;;  %s45_s18 = sshll.u32 %s1866_s17, 4  ;;  %s23_s16 = int_to_ptr.vmem [resolvable:$true] %s22_s16  ;;  %s46_s18 = int_to_ptr.vmem [resolvable:$true] %s45_s18 }
  0x16   :  { %s1766_s21 = scalar_lea.hbm %s2012_s0, 64 }
  0x17   :  { %p1767_p8 = scmp.ne.s32.totalorder %s2012_s0, %s1766_s21  ;;  %p1770_p9 = scmp.lt.u32.totalorder %s1766_s21, %s2012_s0 }
  0x19   :  { %p1772_p10 = pnand %p1770_p9, %p1767_p8 }
  0x1b   :  { %1775 = shalt.err (!%p1772_p10)
}
  0x1c   :  { %s1776_s1 = scalar_lea.vmem %s23_s16, 64  ;;  %p1781_p12 = scmp.lt.s32.totalorder %s23_s16, %s23_s16 }
  0x1d   :  { %p1777_p11 = scmp.ne.s32.totalorder %s23_s16, %s1776_s1  ;;  %p1782_p13 = scmp.lt.s32.totalorder %s1776_s1, %s1776_s1 }
  0x1f   :  { %p1783_p0 = por %p1782_p13, %p1781_p12 }
  0x21   :  { %p1784_p1 = pnand %p1783_p0, %p1777_p11 }
  0x23   :  { %1787 = shalt.err (!%p1784_p1)
}
  0x24   :  { %25 = dma.hbm_to_vmem [thread:$0]  %s2012_s0, 64, %s23_s16, [#allocation3]  }
  0x25   :  { %s1788_s30 = scalar_lea.hbm %s2015_s3, 12288 }
  0x26   :  { %p1789_p2 = scmp.ne.s32.totalorder %s2015_s3, %s1788_s30  ;;  %p1792_p3 = scmp.lt.u32.totalorder %s1788_s30, %s2015_s3 }
  0x28   :  { %p1794_p4 = pnand %p1792_p3, %p1789_p2 }
  0x2a   :  { %1797 = shalt.err (!%p1794_p4)
}
  0x2b   :  { %s1798_s12 = scalar_lea.vmem %s46_s18, 12288  ;;  %p1803_p6 = scmp.lt.s32.totalorder %s46_s18, %s46_s18 }
  0x2c   :  { %p1799_p5 = scmp.ne.s32.totalorder %s46_s18, %s1798_s12  ;;  %p1804_p7 = scmp.lt.s32.totalorder %s1798_s12, %s1798_s12 }
  0x2e   :  { %p1805_p8 = por %p1804_p7, %p1803_p6 }
  0x30   :  { %p1806_p9 = pnand %p1805_p8, %p1799_p5 }
  0x32   :  { %1809 = shalt.err (!%p1806_p9)
}
  0x33   :  { %s1867_s0 = smov 192   ;;  %s1868_s13 = smov 12  }
  0x34   :  { %51 = dma.hbm_to_vmem [thread:$0]  %s2015_s3, 12288, %s46_s18, [#allocation6], %s1867_s0, %s1867_s0, %s1868_s13  }
  0x35   :  { %s1869_s16 = smov [#allocation8]   ;;  %s1810_s21 = scalar_lea.hbm %s2017_s5, 3072 }
  0x36   :  { %s59_s17 = sshll.u32 %s1869_s16, 4  ;;  %p1811_p10 = scmp.ne.s32.totalorder %s2017_s5, %s1810_s21  ;;  %s60_s17 = int_to_ptr.vmem [resolvable:$true] %s59_s17 }
  0x37   :  { %p1814_p11 = scmp.lt.u32.totalorder %s1810_s21, %s2017_s5 }
  0x39   :  { %p1816_p12 = pnand %p1814_p11, %p1811_p10 }
  0x3b   :  { %1819 = shalt.err (!%p1816_p12)
}
  0x3c   :  { %s1820_s1 = scalar_lea.vmem %s60_s17, 3072  ;;  %p1825_p0 = scmp.lt.s32.totalorder %s60_s17, %s60_s17 }
  0x3d   :  { %p1821_p13 = scmp.ne.s32.totalorder %s60_s17, %s1820_s1  ;;  %p1826_p1 = scmp.lt.s32.totalorder %s1820_s1, %s1820_s1 }
  0x3f   :  { %p1827_p2 = por %p1826_p1, %p1825_p0 }
  0x41   :  { %p1828_p3 = pnand %p1827_p2, %p1821_p13 }
  0x43   :  { %1831 = shalt.err (!%p1828_p3)
}
  0x44   :  { %s1870_s3 = smov 64   ;;  %s1871_s18 = smov 4  }
  0x45   :  { %65 = dma.hbm_to_vmem [thread:$0]  %s2017_s5, 3072, %s60_s17, [#allocation9], %s1870_s3, %s1870_s3, %s1871_s18  }
  0x46   :  { %1854 = dma.done.wait [#allocation3], 64  }
  0x47   :  { %1855 = vsyncadd [#allocation3], 4294967232 }
  0x48   :  { %1856 = dma.done.wait [#allocation6], 12800  }
  0x49   :  { %1857 = vsyncadd [#allocation6], 4294954496 }
  0x4a   :  { %1858 = dma.done.wait [#allocation9], 3072  }
  0x4b   :  { %1859 = vsyncadd [#allocation9], 4294964224  ;;  %v1872_v0 = vmov 0   ;;  %v1586_v1 = vld [vmem:[#allocation5 + $0x4] ss:$16 sps:$4 sm:$0xff]   ;;  %vm128_vm0 = vcmask 130048   ;;  %v88_v56 = vlaneseq }
  0x4c   :  { %164 = vmatprep.mubr.bf16.mxu0 %v1872_v0  ;;  %205 = vmatprep.mubr.bf16.mxu1 %v1872_v0  ;;  %v1588_v2 = vld [vmem:[#allocation5] ss:$16 sps:$4 sm:$0xff]   ;;  %v81_v3 = vld [vmem:[#allocation2] sm:$0xf]  ;;  %v1591_v5 = vld [vmem:[#allocation5 + $0x8] ss:$16 sps:$4 sm:$0xff]  }
  0x4d   :  { %132 = vmatprep.subr.bf16.mxu0 %v1586_v1  ;;  %v1589_v4 = vld [vmem:[#allocation5 + $0xc] ss:$16 sps:$4 sm:$0xff]   ;;  %v1594_v7 = vld [vmem:[#allocation7 + $0x4] ss:$12 sps:$4 sm:$0xff]   ;;  %v1600_v10 = vld [vmem:[#allocation7 + $0x34] ss:$12 sps:$4 sm:$0xff]  }
  0x4e   :  { %133 = vmatpush1.bf16.msra.mxu0 %v1588_v2  ;;  %v1592_v6 = vld [vmem:[#allocation7] ss:$12 sps:$4 sm:$0xff]   ;;  %173 = vmatprep.subr.bf16.mxu1 %v1589_v4  ;;  %v1597_v8 = vld [vmem:[#allocation7 + $0x1c] ss:$12 sps:$4 sm:$0xff]   ;;  %v1595_v9 = vld [vmem:[#allocation7 + $0x18] ss:$12 sps:$4 sm:$0xff]  }
  0x4f   :  { %174 = vmatpush1.bf16.msra.mxu1 %v1591_v5  ;;  %879 = vmatprep.subr.bf16.mxu0 %v1594_v7  ;;  %v1598_v11 = vld [vmem:[#allocation7 + $0x30] ss:$12 sps:$4 sm:$0xff]   ;;  %v1603_v12 = vld [vmem:[#allocation7 + $0x4c] ss:$12 sps:$4 sm:$0xff]   ;;  %v1601_v13 = vld [vmem:[#allocation7 + $0x48] ss:$12 sps:$4 sm:$0xff]  }
  0x50   :  { %v1606_v14 = vld [vmem:[#allocation7 + $0x64] ss:$12 sps:$4 sm:$0xff]   ;;  %v1619_v15 = vld [vmem:[#allocation7 + $0xc8] ss:$12 sps:$4 sm:$0xff]   ;;  %v1604_v17 = vld [vmem:[#allocation7 + $0x60] ss:$12 sps:$4 sm:$0xff]  }
  0x51   :  { %1348 = vmatmul.mubr.msk.bf16.vlgmr.msra.gmra.mrb[0].mxu0 %vm128_vm0, %v81_v3  ;;  %v1620_v16 = vld [vmem:[#allocation7 + $0x8] ss:$12 sps:$4 sm:$0xff]   ;;  %1471 = vmatprep.subr.bf16.mxu1 %v1619_v15  ;;  %v1624_v19 = vld [vmem:[#allocation7 + $0xe0] ss:$12 sps:$4 sm:$0xff]   ;;  %v1607_v21 = vld [vmem:[#allocation7 + $0x78] ss:$12 sps:$4 sm:$0xff]  }
  0x52   :  { %880 = vmatpush1.bf16.msra.mxu0 %v1592_v6  ;;  %1349 = vmatmul.mubr.msk.bf16.vlgmr.msra.gmra.mrb[0].mxu1 %vm128_vm0, %v81_v3  ;;  %v1609_v18 = vld [vmem:[#allocation7 + $0x7c] ss:$12 sps:$4 sm:$0xff]   ;;  %v1625_v20 = vld [vmem:[#allocation7 + $0x20] ss:$12 sps:$4 sm:$0xff]   ;;  %v1629_v22 = vld [vmem:[#allocation7 + $0xf8] ss:$12 sps:$4 sm:$0xff]  }
  0x53   :  { %881 = vmatprep.subr.bf16.mxu0 %v1597_v8  ;;  %1472 = vmatpush3.bf16.msra.mxu1 %v1620_v16  ;;  %v1630_v23 = vld [vmem:[#allocation7 + $0x38] ss:$12 sps:$4 sm:$0xff]   ;;  %v1612_v24 = vld [vmem:[#allocation7 + $0x94] ss:$12 sps:$4 sm:$0xff]   ;;  %v1634_v25 = vld [vmem:[#allocation7 + $0x110] ss:$12 sps:$4 sm:$0xff]  }
  0x54   :  { %1473 = vmatprep.subr.bf16.mxu1 %v1624_v19  ;;  %v1635_v26 = vld [vmem:[#allocation7 + $0x50] ss:$12 sps:$4 sm:$0xff]   ;;  %v1615_v28 = vld [vmem:[#allocation7 + $0xac] ss:$12 sps:$4 sm:$0xff]   ;;  %v1639_v29 = vld [vmem:[#allocation7 + $0x128] ss:$12 sps:$4 sm:$0xff]  }
  0x55   :  { %v1610_v27 = vld [vmem:[#allocation7 + $0x90] ss:$12 sps:$4 sm:$0xff]   ;;  %v1640_v30 = vld [vmem:[#allocation7 + $0x68] ss:$12 sps:$4 sm:$0xff]   ;;  %v1644_v33 = vld [vmem:[#allocation7 + $0x140] ss:$12 sps:$4 sm:$0xff]  }
  0x56   :  { %882 = vmatpush1.bf16.msra.mxu0 %v1595_v9  ;;  %v1613_v31 = vld [vmem:[#allocation7 + $0xa8] ss:$12 sps:$4 sm:$0xff]   ;;  %v1618_v32 = vld [vmem:[#allocation7 + $0xc4] ss:$12 sps:$4 sm:$0xff]   ;;  %v1616_v34 = vld [vmem:[#allocation7 + $0xc0] ss:$12 sps:$4 sm:$0xff]  }
  0x57   :  { %883 = vmatprep.subr.bf16.mxu0 %v1600_v10  ;;  %1474 = vmatpush3.bf16.msra.mxu1 %v1625_v20  ;;  %v1645_v35 = vld [vmem:[#allocation7 + $0x80] ss:$12 sps:$4 sm:$0xff]   ;;  %v1623_v36 = vld [vmem:[#allocation7 + $0xdc] ss:$12 sps:$4 sm:$0xff]   ;;  %v1621_v37 = vld [vmem:[#allocation7 + $0xd8] ss:$12 sps:$4 sm:$0xff]  }
  0x58   :  { %1475 = vmatprep.subr.bf16.mxu1 %v1629_v22  ;;  %v1628_v38 = vld [vmem:[#allocation7 + $0xf4] ss:$12 sps:$4 sm:$0xff]   ;;  %v1626_v39 = vld [vmem:[#allocation7 + $0xf0] ss:$12 sps:$4 sm:$0xff]   ;;  %v1633_v40 = vld [vmem:[#allocation7 + $0x10c] ss:$12 sps:$4 sm:$0xff]  }
  0x59   :  { %v1631_v41 = vld [vmem:[#allocation7 + $0x108] ss:$12 sps:$4 sm:$0xff]   ;;  %v1638_v42 = vld [vmem:[#allocation7 + $0x124] ss:$12 sps:$4 sm:$0xff]   ;;  %v1636_v43 = vld [vmem:[#allocation7 + $0x120] ss:$12 sps:$4 sm:$0xff]  }
  0x5a   :  { %884 = vmatpush1.bf16.msra.mxu0 %v1598_v11  ;;  %v1643_v44 = vld [vmem:[#allocation7 + $0x13c] ss:$12 sps:$4 sm:$0xff]   ;;  %v1641_v45 = vld [vmem:[#allocation7 + $0x138] ss:$12 sps:$4 sm:$0xff]   ;;  %v1648_v46 = vld [vmem:[#allocation7 + $0x154] ss:$12 sps:$4 sm:$0xff]  }
  0x5b   :  { %885 = vmatprep.subr.bf16.mxu0 %v1603_v12  ;;  %1476 = vmatpush3.bf16.msra.mxu1 %v1630_v23  ;;  %v1649_v47 = vld [vmem:[#allocation7 + $0x158] ss:$12 sps:$4 sm:$0xff]   ;;  %v1646_v48 = vld [vmem:[#allocation7 + $0x150] ss:$12 sps:$4 sm:$0xff]   ;;  %v1651_v52 = vld [vmem:[#allocation7 + $0x168] ss:$12 sps:$4 sm:$0xff]  }
  0x5c   :  { %1477 = vmatprep.subr.bf16.mxu1 %v1634_v25  ;;  %v1650_v49 = vld [vmem:[#allocation7 + $0x98] ss:$12 sps:$4 sm:$0xff]   ;;  %v1654_v51 = vld [vmem:[#allocation7 + $0x170] ss:$12 sps:$4 sm:$0xff]   ;;  %v1659_v55 = vld [vmem:[#allocation7 + $0x248] ss:$12 sps:$4 sm:$0xff]  }
  0x5d   :  { %v1653_v50 = vld [vmem:[#allocation7 + $0x16c] ss:$12 sps:$4 sm:$0xff]   ;;  %v1655_v53 = vld [vmem:[#allocation7 + $0xb0] ss:$12 sps:$4 sm:$0xff]   ;;  %v1964_v57 = vshrl.u32 %v88_v56, 7  ;;  %vm1874_vm1 = vmmov 0  }
  0x5e   :  { %886 = vmatpush1.bf16.msra.mxu0 %v1601_v13  ;;  %v1658_v54 = vld [vmem:[#allocation7 + $0x184] ss:$12 sps:$4 sm:$0xff]   ;;  %v1970_v59 = vld [vmem:[%s2014_s2] sm:$0xf]  ;;  %v1656_v15 = vld [vmem:[#allocation7 + $0x180] ss:$12 sps:$4 sm:$0xff]  }
  0x5f   :  { %887 = vmatprep.subr.bf16.mxu0 %v1606_v14  ;;  %1478 = vmatpush3.bf16.msra.mxu1 %v1635_v26  ;;  %v90_v58 = vsub.s32 0, %v1964_v57  ;;  %v94_v60 = vsub.s32 1, %v1964_v57  ;;  %v102_v61 = vsub.s32 3, %v1964_v57  ;;  %v1660_v16 = vld [vmem:[#allocation7 + $0x188] ss:$12 sps:$4 sm:$0xff]   ;;  %s1875_s8 = smov [#allocation10]  }
  0x60   :  { %1479 = vmatprep.subr.bf16.mxu1 %v1639_v29  ;;  %v1663_v19 = vld [vmem:[#allocation7 + $0x19c] ss:$12 sps:$4 sm:$0xff]   ;;  %v1664_v20 = vld [vmem:[#allocation7 + $0x260] ss:$12 sps:$4 sm:$0xff]   ;;  %v1661_v22 = vld [vmem:[#allocation7 + $0x198] ss:$12 sps:$4 sm:$0xff]  }
  0x61   :  { %v91_v62 = vrot.slane %v1970_v59, %v90_v58  ;;  %v95_v63 = vrot.slane %v1970_v59, %v94_v60  ;;  %v103_v1 = vrot.slane %v1970_v59, %v102_v61  ;;  %v1665_v23 = vld [vmem:[#allocation7 + $0x1a0] ss:$12 sps:$4 sm:$0xff]   ;;  %v1669_v25 = vld [vmem:[#allocation7 + $0x278] ss:$12 sps:$4 sm:$0xff]   ;;  %v1666_v26 = vld [vmem:[#allocation7 + $0x1b0] ss:$12 sps:$4 sm:$0xff]  }
  0x62   :  { %888 = vmatpush1.bf16.msra.mxu0 %v1604_v17  ;;  %v1674_v29 = vld [vmem:[#allocation7 + $0x290] ss:$12 sps:$4 sm:$0xff]   ;;  %v1699_v56 = vld [vmem:[#allocation7 + $0x258] ss:$12 sps:$4 sm:$0xff]   ;;  %s1333_s9 = sshll.u32 %s1875_s8, 4  ;;  %s1334_s9 = int_to_ptr.vmem [resolvable:$true] %s1333_s9 }
  0x63   :  { %889 = vmatprep.subr.bf16.mxu0 %v1609_v18  ;;  %1480 = vmatpush3.bf16.msra.mxu1 %v1640_v30  ;;  %v1671_v30 = vld [vmem:[#allocation7 + $0x1c8] ss:$12 sps:$4 sm:$0xff]   ;;  %v1702_v61 = vld [vmem:[#allocation7 + $0x270] ss:$12 sps:$4 sm:$0xff]   ;;  %s1832_s10 = scalar_lea.vmem %s1334_s9, 128  ;;  %p1837_p5 = scmp.lt.s32.totalorder %s1334_s9, %s1334_s9 }
  0x64   :  { %1481 = vmatprep.subr.bf16.mxu1 %v1644_v33  ;;  %v1679_v33 = vld [vmem:[#allocation7 + $0x2a8] ss:$12 sps:$4 sm:$0xff]   ;;  %p1833_p4 = scmp.ne.s32.totalorder %s1334_s9, %s1832_s10  ;;  %p1838_p6 = scmp.lt.s32.totalorder %s1832_s10, %s1832_s10 }
  0x66   :  { %890 = vmatpush1.bf16.msra.mxu0 %v1607_v21  ;;  %p1839_p7 = por %p1838_p6, %p1837_p5 }
  0x67   :  { %891 = vmatprep.subr.bf16.mxu0 %v1612_v24  ;;  %1482 = vmatpush3.bf16.msra.mxu1 %v1645_v35  ;;  %v1668_v24 = vld [vmem:[#allocation7 + $0x1b4] ss:$12 sps:$4 sm:$0xff]  }
  0x68   :  { %1483 = vmatprep.subr.bf16.mxu1 %v1649_v47  ;;  %v1676_v35 = vld [vmem:[#allocation7 + $0x1e0] ss:$12 sps:$4 sm:$0xff]   ;;  %p1840_p8 = pnand %p1839_p7, %p1833_p4 }
  0x69   :  { %v1693_v47 = vld [vmem:[#allocation7 + $0x22c] ss:$12 sps:$4 sm:$0xff]  }
  0x6a   :  { %892 = vmatpush1.bf16.msra.mxu0 %v1610_v27  ;;  %v1670_v27 = vld [vmem:[#allocation7 + $0x1b8] ss:$12 sps:$4 sm:$0xff]  }
  0x6b   :  { %893 = vmatprep.subr.bf16.mxu0 %v1615_v28  ;;  %1484 = vmatpush3.bf16.msra.mxu1 %v1650_v49  ;;  %v1673_v28 = vld [vmem:[#allocation7 + $0x1cc] ss:$12 sps:$4 sm:$0xff]  }
  0x6c   :  { %1485 = vmatprep.subr.bf16.mxu1 %v1654_v51  ;;  %v1695_v51 = vld [vmem:[#allocation7 + $0x230] ss:$12 sps:$4 sm:$0xff]  }
  0x6e   :  { %894 = vmatpush1.bf16.msra.mxu0 %v1613_v31  ;;  %v1675_v31 = vld [vmem:[#allocation7 + $0x1d0] ss:$12 sps:$4 sm:$0xff]  }
  0x6f   :  { %895 = vmatprep.subr.bf16.mxu0 %v1618_v32  ;;  %1486 = vmatpush3.bf16.msra.mxu1 %v1655_v53  ;;  %v1678_v32 = vld [vmem:[#allocation7 + $0x1e4] ss:$12 sps:$4 sm:$0xff]  }
  0x70   :  { %1493 = vmatprep.subr.bf16.mxu1 %v1659_v55  ;;  %v1701_v55 = vld [vmem:[#allocation7 + $0x25c] ss:$12 sps:$4 sm:$0xff]  }
  0x72   :  { %896 = vmatpush1.bf16.msra.mxu0 %v1616_v34  ;;  %v98_v34 = vsub.s32 2, %v1964_v57  ;;  %v1738_v57 = vld [vmem:[#allocation8 + $0x90] sm:$0xff]  }
  0x73   :  { %897 = vmatprep.subr.bf16.mxu0 %v1623_v36  ;;  %v1680_v36 = vld [vmem:[#allocation7 + $0x1e8] ss:$12 sps:$4 sm:$0xff]  }
  0x76   :  { %898 = vmatpush1.bf16.msra.mxu0 %v1621_v37  ;;  %v1683_v37 = vld [vmem:[#allocation7 + $0x1fc] ss:$12 sps:$4 sm:$0xff]  }
  0x77   :  { %899 = vmatprep.subr.bf16.mxu0 %v1628_v38  ;;  %v1684_v38 = vld [vmem:[#allocation7 + $0x2c0] ss:$12 sps:$4 sm:$0xff]  }
  0x7a   :  { %900 = vmatpush1.bf16.msra.mxu0 %v1626_v39  ;;  %v99_v39 = vrot.slane %v1970_v59, %v98_v34  ;;  %v1704_v59 = vld [vmem:[#allocation7 + $0x274] ss:$12 sps:$4 sm:$0xff]  }
  0x7b   :  { %901 = vmatprep.subr.bf16.mxu0 %v1633_v40  ;;  %v1681_v40 = vld [vmem:[#allocation7 + $0x1f8] ss:$12 sps:$4 sm:$0xff]  }
  0x7e   :  { %902 = vmatpush1.bf16.msra.mxu0 %v1631_v41  ;;  %v1685_v41 = vld [vmem:[#allocation7 + $0x200] ss:$12 sps:$4 sm:$0xff]  }
  0x7f   :  { %903 = vmatprep.subr.bf16.mxu0 %v1638_v42  ;;  %v1688_v42 = vld [vmem:[#allocation7 + $0x214] ss:$12 sps:$4 sm:$0xff]  }
  0x82   :  { %904 = vmatpush1.bf16.msra.mxu0 %v1636_v43  ;;  %v1689_v43 = vld [vmem:[#allocation7 + $0x2d8] ss:$12 sps:$4 sm:$0xff]  }
  0x83   :  { %905 = vmatprep.subr.bf16.mxu0 %v1643_v44 }
  0x86   :  { %906 = vmatpush1.bf16.msra.mxu0 %v1641_v45  ;;  %v1686_v45 = vld [vmem:[#allocation7 + $0x210] ss:$12 sps:$4 sm:$0xff]  }
  0x87   :  { %907 = vmatprep.subr.bf16.mxu0 %v1648_v46  ;;  %v1690_v46 = vld [vmem:[#allocation7 + $0x218] ss:$12 sps:$4 sm:$0xff]  }
  0x8a   :  { %908 = vmatpush1.bf16.msra.mxu0 %v1646_v48  ;;  %v1694_v48 = vld [vmem:[#allocation7 + $0x2f0] ss:$12 sps:$4 sm:$0xff]  }
  0x8b   :  { %909 = vmatprep.subr.bf16.mxu0 %v1653_v50  ;;  %v1691_v50 = vld [vmem:[#allocation7 + $0x228] ss:$12 sps:$4 sm:$0xff]  }
  0x8e   :  { %910 = vmatpush1.bf16.msra.mxu0 %v1651_v52  ;;  %v1698_v52 = vld [vmem:[#allocation7 + $0x244] ss:$12 sps:$4 sm:$0xff]  }
  0x8f   :  { %920 = vmatprep.subr.bf16.mxu0 %v1658_v54  ;;  %v1696_v54 = vld [vmem:[#allocation7 + $0x240] ss:$12 sps:$4 sm:$0xff]  }
 0x124   :  { %v166_v0 = vpop.f32.mrb[0].mxu0 }
 0x125   :  { %v167_v2 = vadd.f32 %v166_v0, %v91_v62  ;;  %v168_v3 = vpop.f32.mrb[1].mxu0  ;;  %v1981_v6 = vpop.f32.mrb[0].mxu1  ;;  %v1707_v62 = vld [vmem:[#allocation7 + $0x28c] ss:$12 sps:$4 sm:$0xff]   ;;  %v1710_v0 = vld [vmem:[#allocation7 + $0x2a4] ss:$12 sps:$4 sm:$0xff]  }
 0x126   :  { %v169_v4 = vadd.f32 %v168_v3, %v95_v63  ;;  %v170_v5 = vpop.f32.mrb[2].mxu0  ;;  %v209_v9 = vpop.f32.mrb[1].mxu1  ;;  %v208_v44 = vadd.f32 %v1981_v6, %v99_v39  ;;  %v1705_v63 = vld [vmem:[#allocation7 + $0x288] ss:$12 sps:$4 sm:$0xff]   ;;  %v1711_v3 = vld [vmem:[#allocation7 + $0x2b8] ss:$12 sps:$4 sm:$0xff]  }
 0x127   :  { %v214_v7 = vmax.f32 %v167_v2, 0.0  ;;  %v171_v8 = vpop.f32.mrb[3].mxu0  ;;  %v210_v11 = vadd.f32 %v209_v9, %v103_v1  ;;  %v211_v12 = vpop.f32.mrb[2].mxu1  ;;  %v1708_v1 = vld [vmem:[#allocation7 + $0x2a0] ss:$12 sps:$4 sm:$0xff]  }
 0x128   :  { %v215_v10 = vmax.f32 %v169_v4, 0.0  ;;  %v212_v13 = vpop.f32.mrb[3].mxu1  ;;  %v216_v49 = vmax.f32 %v208_v44, 0.0  ;;  %v1713_v2 = vld [vmem:[#allocation7 + $0x2bc] ss:$12 sps:$4 sm:$0xff]   ;;  %v1720_v8 = vld [vmem:[#allocation8 + $0x40] sm:$0xff]  }
 0x129   :  { %v217_v17 = vmax.f32 %v210_v11, 0.0  ;;  %v218_v18 = vpack.c.bf16 %v214_v7, %v214_v7  ;;  %v1716_v4 = vld [vmem:[#allocation7 + $0x2d4] ss:$12 sps:$4 sm:$0xff]   ;;  %v1714_v5 = vld [vmem:[#allocation7 + $0x2d0] ss:$12 sps:$4 sm:$0xff]   ;;  %v1723_v11 = vld [vmem:[#allocation8 + $0x8] sm:$0xff]  }
 0x12a   :  { %v219_v14 = vpack.c.bf16 %v215_v10, %v215_v10  ;;  %v220_v53 = vpack.c.bf16 %v216_v49, %v216_v49  ;;  %v1719_v6 = vld [vmem:[#allocation7 + $0x2ec] ss:$12 sps:$4 sm:$0xff]   ;;  %v1717_v7 = vld [vmem:[#allocation7 + $0x2e8] ss:$12 sps:$4 sm:$0xff]   ;;  %v1721_v9 = vld [vmem:[#allocation8] sm:$0xff]  }
 0x12b   :  { %v221_v21 = vpack.c.bf16 %v217_v17, %v217_v17  ;;  %v1722_v10 = vld [vmem:[#allocation8 + $0x48] sm:$0xff]   ;;  %v1724_v12 = vld [vmem:[#allocation8 + $0x50] sm:$0xff]   ;;  %v1729_v17 = vld [vmem:[#allocation8 + $0x20] sm:$0xff]  }
 0x12c   :  { %911 = vmatprep.mubr.bf16.mxu0 %v219_v14  ;;  %993 = vmatprep.mubr.bf16.mxu1 %v219_v14  ;;  %v1725_v13 = vld [vmem:[#allocation8 + $0x10] sm:$0xff]   ;;  %v1726_v14 = vld [vmem:[#allocation8 + $0x58] sm:$0xff]  }
 0x12d   :  { %912 = vmatmul.mubr.bf16.vlgmr.msra.gmra.mrb[4].mxu0 %v218_v18  ;;  %994 = vmatmul.mubr.bf16.vlgmr.msra.gmra.mrb[4].mxu1 %v218_v18  ;;  %v1730_v18 = vld [vmem:[#allocation8 + $0x68] sm:$0xff]  }
 0x12e   :  { %921 = vmatpush1.bf16.msra.mxu0 %v1656_v15  ;;  %1494 = vmatpush3.bf16.msra.mxu1 %v1660_v16  ;;  %v1727_v15 = vld [vmem:[#allocation8 + $0x18] sm:$0xff]   ;;  %v1728_v16 = vld [vmem:[#allocation8 + $0x60] sm:$0xff]  }
 0x12f   :  { %922 = vmatprep.subr.bf16.mxu0 %v1663_v19  ;;  %1495 = vmatprep.subr.bf16.mxu1 %v1664_v20  ;;  %v1731_v19 = vld [vmem:[#allocation8 + $0x28] sm:$0xff]   ;;  %v1732_v20 = vld [vmem:[#allocation8 + $0x70] sm:$0xff]  }
 0x130   :  { %1033 = vmatprep.mubr.bf16.mxu1 %v221_v21  ;;  %952 = vmatprep.mubr.bf16.mxu0 %v221_v21  ;;  %v1733_v21 = vld [vmem:[#allocation8 + $0x30] sm:$0xff]  }
 0x132   :  { %923 = vmatpush1.bf16.msra.mxu0 %v1661_v22  ;;  %1496 = vmatpush3.bf16.msra.mxu1 %v1665_v23  ;;  %v1734_v22 = vld [vmem:[#allocation8 + $0x78] sm:$0xff]  }
 0x133   :  { %924 = vmatprep.subr.bf16.mxu0 %v1668_v24  ;;  %1497 = vmatprep.subr.bf16.mxu1 %v1669_v25  ;;  %v1735_v23 = vld [vmem:[#allocation8 + $0x38] sm:$0xff]   ;;  %v1873_v24 = vmov 0.0  }
 0x136   :  { %925 = vmatpush1.bf16.msra.mxu0 %v1666_v26  ;;  %1498 = vmatpush3.bf16.msra.mxu1 %v1670_v27 }
 0x137   :  { %926 = vmatprep.subr.bf16.mxu0 %v1673_v28  ;;  %1499 = vmatprep.subr.bf16.mxu1 %v1674_v29 }
 0x13a   :  { %927 = vmatpush1.bf16.msra.mxu0 %v1671_v30  ;;  %1500 = vmatpush3.bf16.msra.mxu1 %v1675_v31  ;;  %v350_v30 = vld [vmem:[%s2016_s4] sm:$0x7] }
 0x13b   :  { %928 = vmatprep.subr.bf16.mxu0 %v1678_v32  ;;  %1501 = vmatprep.subr.bf16.mxu1 %v1679_v33  ;;  %v363_v31 = vrot.slane %v350_v30, %v98_v34 }
 0x13e   :  { %929 = vmatpush1.bf16.msra.mxu0 %v1676_v35  ;;  %1502 = vmatpush3.bf16.msra.mxu1 %v1680_v36 }
 0x13f   :  { %930 = vmatprep.subr.bf16.mxu0 %v1683_v37  ;;  %1503 = vmatprep.subr.bf16.mxu1 %v1684_v38 }
 0x142   :  { %931 = vmatpush1.bf16.msra.mxu0 %v1681_v40  ;;  %1504 = vmatpush3.bf16.msra.mxu1 %v1685_v41  ;;  %v355_v40 = vrot.slane %v350_v30, %v90_v58  ;;  %v359_v41 = vrot.slane %v350_v30, %v94_v60  ;;  %v1739_v58 = vld [vmem:[#allocation8 + $0x98] sm:$0xff]   ;;  %v1740_v60 = vld [vmem:[#allocation8 + $0xa0] sm:$0xff]  }
 0x143   :  { %932 = vmatprep.subr.bf16.mxu0 %v1688_v42  ;;  %1505 = vmatprep.subr.bf16.mxu1 %v1689_v43 }
 0x146   :  { %933 = vmatpush1.bf16.msra.mxu0 %v1686_v45  ;;  %1506 = vmatpush3.bf16.msra.mxu1 %v1690_v46 }
 0x147   :  { %934 = vmatprep.subr.bf16.mxu0 %v1693_v47  ;;  %1507 = vmatprep.subr.bf16.mxu1 %v1694_v48 }
 0x14a   :  { %935 = vmatpush1.bf16.msra.mxu0 %v1691_v50  ;;  %1508 = vmatpush3.bf16.msra.mxu1 %v1695_v51  ;;  %v1736_v50 = vld [vmem:[#allocation8 + $0x80] sm:$0xff]  }
 0x14b   :  { %936 = vmatprep.subr.bf16.mxu0 %v1698_v52  ;;  %1515 = vmatprep.subr.bf16.mxu1 %v1720_v8  ;;  %v1737_v52 = vld [vmem:[#allocation8 + $0x88] sm:$0xff]  }
 0x14d   :  { %1034 = vmatmul.mubr.bf16.vlgmr.msra.gmra.mrb[8].mxu1 %v220_v53 }
 0x14e   :  { %937 = vmatpush1.bf16.msra.mxu0 %v1696_v54  ;;  %1516 = vmatpush3.bf16.msra.mxu1 %v1721_v9  ;;  %v1742_v54 = vld [vmem:[#allocation8 + $0xb0] sm:$0xff]  }
 0x14f   :  { %938 = vmatprep.subr.bf16.mxu0 %v1701_v55  ;;  %1517 = vmatprep.subr.bf16.mxu1 %v1722_v10  ;;  %v1743_v55 = vld [vmem:[#allocation8 + $0xb8] sm:$0xff]  }
 0x152   :  { %939 = vmatpush1.bf16.msra.mxu0 %v1699_v56  ;;  %1518 = vmatpush3.bf16.msra.mxu1 %v1723_v11 }
 0x153   :  { %940 = vmatprep.subr.bf16.mxu0 %v1704_v59  ;;  %1519 = vmatprep.subr.bf16.mxu1 %v1724_v12 }
 0x156   :  { %941 = vmatpush1.bf16.msra.mxu0 %v1702_v61  ;;  %1520 = vmatpush3.bf16.msra.mxu1 %v1725_v13 }
 0x157   :  { %942 = vmatprep.subr.bf16.mxu0 %v1707_v62  ;;  %1521 = vmatprep.subr.bf16.mxu1 %v1726_v14 }
 0x15a   :  { %943 = vmatpush1.bf16.msra.mxu0 %v1705_v63  ;;  %1522 = vmatpush3.bf16.msra.mxu1 %v1727_v15 }
 0x15b   :  { %944 = vmatprep.subr.bf16.mxu0 %v1710_v0  ;;  %1523 = vmatprep.subr.bf16.mxu1 %v1728_v16 }
 0x15e   :  { %945 = vmatpush1.bf16.msra.mxu0 %v1708_v1  ;;  %1524 = vmatpush3.bf16.msra.mxu1 %v1729_v17 }
 0x15f   :  { %946 = vmatprep.subr.bf16.mxu0 %v1713_v2  ;;  %1525 = vmatprep.subr.bf16.mxu1 %v1730_v18  ;;  %v1446_v2 = vld [vmem:[%s2018_s6] ss:$0 sm:$0xff] }
 0x162   :  { %947 = vmatpush1.bf16.msra.mxu0 %v1711_v3  ;;  %1526 = vmatpush3.bf16.msra.mxu1 %v1731_v19 }
 0x163   :  { %948 = vmatprep.subr.bf16.mxu0 %v1716_v4  ;;  %1527 = vmatprep.subr.bf16.mxu1 %v1732_v20 }
 0x166   :  { %949 = vmatpush1.bf16.msra.mxu0 %v1714_v5  ;;  %1528 = vmatpush3.bf16.msra.mxu1 %v1733_v21 }
 0x167   :  { %950 = vmatprep.subr.bf16.mxu0 %v1719_v6  ;;  %1529 = vmatprep.subr.bf16.mxu1 %v1734_v22 }
 0x16a   :  { %951 = vmatpush1.bf16.msra.mxu0 %v1717_v7  ;;  %1530 = vmatpush3.bf16.msra.mxu1 %v1735_v23 }
 0x16b   :  { %1546 = vmatprep.subr.bf16.mxu1 %v1873_v24 }
 0x16d   :  { %953 = vmatmul.mubr.bf16.vlgmr.msra.gmra.mrb[4].mxu0 %v220_v53  ;;  %v1741_v53 = vld [vmem:[#allocation8 + $0xa8] sm:$0xff]  }
 0x200   :  { %v1487_v25 = vpop.f32.mrb[4].mxu1 }
 0x201   :  { %v1488_v26 = vpop.f32.mrb[5].mxu1 }
 0x202   :  { %v1489_v27 = vadd.f32 %v1488_v26, %v1487_v25  ;;  %v1490_v28 = vpop.f32.mrb[6].mxu1 }
 0x203   :  { %v1491_v29 = vpop.f32.mrb[7].mxu1 }
 0x204   :  { %v996_v35 = vadd.f32 %v1489_v27, %v363_v31 }
 0x220   :  { %v1509_v32 = vpop.f32.mrb[8].mxu1 }
 0x221   :  { %v1510_v33 = vpop.f32.mrb[9].mxu1 }
 0x222   :  { %v1511_v36 = vadd.f32 %v1510_v33, %v1509_v32  ;;  %v1512_v37 = vpop.f32.mrb[10].mxu1 }
 0x223   :  { %v1513_v38 = vpop.f32.mrb[11].mxu1 }
 0x224   :  { %v1036_v39 = vadd.f32 %v1511_v36, %v996_v35 }
 0x226   :  { %v1043_v56 = vmax.f32 %v1036_v39, 0.0 }
 0x228   :  { %v1046_v59 = vpack.c.bf16 %v1043_v56, %v1043_v56 }
 0x240   :  { %v954_v42 = vpop.f32.mrb[4].mxu0 }
 0x241   :  { %v1566_v43 = vadd.f32 %v954_v42, %v355_v40  ;;  %v956_v44 = vpop.f32.mrb[5].mxu0 }
 0x242   :  { %v1567_v45 = vadd.f32 %v956_v44, %v359_v41  ;;  %v958_v46 = vpop.f32.mrb[6].mxu0 }
 0x243   :  { %v1041_v47 = vmax.f32 %v1566_v43, 0.0  ;;  %v959_v34 = vpop.f32.mrb[7].mxu0 }
 0x244   :  { %v1042_v48 = vmax.f32 %v1567_v45, 0.0 }
 0x245   :  { %v1044_v51 = vpack.c.bf16 %v1041_v47, %v1041_v47 }
 0x246   :  { %v1045_v49 = vpack.c.bf16 %v1042_v48, %v1042_v48 }
 0x248   :  { %1278 = vmatprep.mubr.bf16.mxu1 %v1045_v49 }
 0x249   :  { %1279 = vmatmul.mubr.bf16.vlgmr.msra.gmra.mrb[12].mxu1 %v1044_v51 }
 0x24a   :  { %1547 = vmatpush3.bf16.msra.mxu1 %v1736_v50  ;;  %1562 = vmatprep.mubr.msk.bf16.mxu1 %vm1874_vm1, %v1873_v24 }
 0x24b   :  { %1548 = vmatprep.subr.bf16.mxu1 %v1873_v24 }
 0x24e   :  { %1549 = vmatpush3.bf16.msra.mxu1 %v1737_v52 }
 0x24f   :  { %1550 = vmatprep.subr.bf16.mxu1 %v1873_v24 }
 0x252   :  { %1551 = vmatpush3.bf16.msra.mxu1 %v1738_v57 }
 0x253   :  { %1552 = vmatprep.subr.bf16.mxu1 %v1873_v24 }
 0x256   :  { %1553 = vmatpush3.bf16.msra.mxu1 %v1739_v58 }
 0x257   :  { %1554 = vmatprep.subr.bf16.mxu1 %v1873_v24 }
 0x25a   :  { %1555 = vmatpush3.bf16.msra.mxu1 %v1740_v60 }
 0x25b   :  { %1556 = vmatprep.subr.bf16.mxu1 %v1873_v24 }
 0x25e   :  { %1557 = vmatpush3.bf16.msra.mxu1 %v1741_v53 }
 0x25f   :  { %1558 = vmatprep.subr.bf16.mxu1 %v1873_v24 }
 0x262   :  { %1559 = vmatpush3.bf16.msra.mxu1 %v1742_v54 }
 0x263   :  { %1560 = vmatprep.subr.bf16.mxu1 %v1873_v24 }
 0x266   :  { %1561 = vmatpush3.bf16.msra.mxu1 %v1743_v55 }
 0x269   :  { %1563 = vmatmul.mubr.bf16.vlgmr.msra.gmra.mrb[16].mxu1 %v1046_v59 }
 0x31c   :  { %v1531_v61 = vpop.f32.mrb[12].mxu1 }
 0x31d   :  { %v1532_v62 = vpop.f32.mrb[13].mxu1 }
 0x31e   :  { %v1533_v63 = vadd.f32 %v1532_v62, %v1531_v61  ;;  %v1534_v0 = vpop.f32.mrb[14].mxu1 }
 0x31f   :  { %v1535_v1 = vpop.f32.mrb[15].mxu1 }
 0x320   :  { %v1281_v3 = vadd.f32 %v1533_v63, %v1446_v2 }
 0x33c   :  { %v1320_v4 = vpop.f32.mrb[16].mxu1 }
 0x33d   :  { %v1321_v5 = vadd.f32 %v1320_v4, %v1281_v3  ;;  %v1564_v6 = vpop.f32.mrb[17].mxu1 }
 0x33e   :  { %v1323_v7 = vpop.f32.mrb[18].mxu1 }
 0x33f   :  { %1326 = vst [vmem:[#allocation10] sm:$0xff] %v1321_v5  ;;  %v1565_v8 = vpop.f32.mrb[19].mxu1 }
 0x340   :  { %1843 = shalt.err (!%p1840_p8)
}
 0x341   :  { %s1844_s6 = scalar_lea.hbm %s2019_s7, 128 }
 0x342   :  { %p1845_p9 = scmp.ne.s32.totalorder %s2019_s7, %s1844_s6  ;;  %p1848_p10 = scmp.lt.u32.totalorder %s1844_s6, %s2019_s7 }
 0x344   :  { %p1850_p11 = pnand %p1848_p10, %p1845_p9 }
 0x346   :  { %1853 = shalt.err (!%p1850_p11)
}
 0x347   :  { %1336 = dma.vmem_to_hbm [thread:$0]  %s1334_s9, 128, %s2019_s7, [#allocation4]  }
 0x348   :  { %1860 = dma.done.wait [#allocation4], 128  }
 0x349   :  { %1861 = vsyncadd [#allocation4], 4294967168 }
 0x34a   :  { %1340 = vsyncpa [#allocation3], 1 }
 0x34b   :  { %1341 = vsyncpa [#allocation6], 1 }
 0x34c   :  { %1342 = vsyncpa [#allocation9], 1 }
 0x34d   :  { %1343 = vsyncpa [#allocation4], 1 }

</bundles_post_ra>
